<compile_context>
chip_gen: v6e
topology: v6e:2x2x1
jax: 0.10.0
libtpu: 0.0.40
codegen_flags: <defaults>
</compile_context>

<pallas_src>
import jax
import jax.numpy as jnp
import numpy as np
from jax.experimental import pallas as pl
from jax.experimental.pallas import tpu as pltpu

LANE = 128


def _round_up(x, m):
    return (x + m - 1) // m * m


def _choose_tb(B, cap=256):
    """Pick batch tile (multiple of 8) and padded batch.  Prefers tiles that
    divide the padded batch exactly (no wasted tail step) with >= 2 grid steps
    of >= 32 rows each; tiny batches fall back to a single step."""
    b8 = _round_up(B, 8)
    if b8 < 64:
        return b8, b8                       # single step covering whole batch
    top = min(cap, (b8 // 2) // 8 * 8)
    for tb in range(top, 31, -8):           # largest exact divisor first
        if b8 % tb == 0:
            return tb, b8
    tb = min(cap, max(32, _round_up((B + 1) // 2, 8)))
    return tb, _round_up(B, tb)


# ---------------------------------------------------------------------------
# Pallas kernel: fused conv(all windows) + ReLU + max-pool + FC for TB rows
# ---------------------------------------------------------------------------
def textcnn_kernel(xu_ref, wconv_ref, bmask_ref, wfc_ref, bfc_ref, o_ref):
    # xu_ref:    (TB, LOUT_PAD, KU)   bf16 pre-im2col slab, KU = W_MAX*V (=128)
    # wconv_ref: (KU, C_PAD)          bf16 unified conv weight (all windows)
    # bmask_ref: (LOUT_PAD, C_PAD)    f32  conv bias at valid positions, -1e30 at invalid
    # wfc_ref:   (C_PAD, N_PAD)       bf16 fc weight (in_features x out_features)
    # bfc_ref:   (1, N_PAD)           f32
    # o_ref:     (TB, N_PAD)          bf16 logits (lane padded)
    tb, lout, ku = xu_ref.shape
    c_pad = wconv_ref.shape[1]

    xu = xu_ref[...].reshape(tb * lout, ku)               # free collapse (lane-dense)

    # single MXU matmul covering every window and every output channel
    acc = jnp.dot(xu, wconv_ref[...], preferred_element_type=jnp.float32)
    acc = acc.reshape(tb, lout, c_pad)

    # fused bias + ReLU + validity mask: invalid positions have bias = -1e30,
    # so max(acc + bias, 0) == 0 there (exact, since ReLU outputs are >= 0).
    relu = jnp.maximum(acc + bmask_ref[...][None, :, :], 0.0)
    pooled = jnp.max(relu, axis=1)                         # (TB, C_PAD) f32

    # TODO(synk): dropout omitted — eval-mode (identity) semantics.
    logits = jnp.dot(pooled.astype(wfc_ref.dtype), wfc_ref[...],
                     preferred_element_type=jnp.float32) + bfc_ref[...]
    o_ref[...] = logits.astype(o_ref.dtype)


# ---------------------------------------------------------------------------
# Wrapper: operand packing (layout plumbing) + pallas_call
# ---------------------------------------------------------------------------
def textcnn_forward(emb_table, token_ids, conv_ws, conv_bs, wfc, bfc, windows,
                    compute_dtype=jnp.bfloat16):
    """emb_table: (vocab, V) f32; token_ids: (B, L) int32;
    conv_ws[i]: (win_i, V, C); conv_bs[i]: (1, C);
    wfc: (nW*C, num_classes); bfc: (1, num_classes)."""
    B, L = token_ids.shape
    V = emb_table.shape[1]
    nW = len(windows)
    C = conv_ws[0].shape[2]
    num_classes = wfc.shape[1]

    w_max = max(windows)
    lout = L - min(windows) + 1            # unified number of window positions
    lout_pad = _round_up(lout, 16)         # keeps (TB, LOUT) <-> (TB*LOUT) reshapes tile-aligned
    ku = w_max * V                         # unified contraction (=128 at V=32)
    c_pad = _round_up(max(nW * C, LANE), LANE)
    n_pad = _round_up(max(num_classes, LANE), LANE)

    tb, b_pad = _choose_tb(B)

    # ---- embedding gather directly in bf16 (no separate f32 staging pass) ----
    x_bf = jnp.take(emb_table.astype(compute_dtype), token_ids, axis=0)   # (B, L, V)

    # ---- pre-im2col slab: taps folded into the lane dim -> (b_pad, LOUT_PAD, KU) ----
    l_need = lout_pad + w_max - 1
    x_padded = jnp.pad(x_bf, ((0, b_pad - B), (0, l_need - L), (0, 0)))
    slab = jnp.concatenate([x_padded[:, k:k + lout_pad, :] for k in range(w_max)],
                           axis=-1)                                        # (b_pad, LOUT_PAD, KU)

    # ---- unified conv weight: tap-major rows, window-major channel columns ----
    wconv = jnp.zeros((ku, c_pad), jnp.float32)
    for i, (win, w) in enumerate(zip(windows, conv_ws)):
        wconv = wconv.at[:win * V, i * C:(i + 1) * C].set(w.reshape(win * V, C))
    wconv = wconv.astype(compute_dtype)

    # ---- fused bias/mask: bias at valid positions, -1e30 everywhere else ----
    bias_mask = jnp.full((lout_pad, c_pad), -1e30, jnp.float32)
    for i, (win, b) in enumerate(zip(windows, conv_bs)):
        valid = L - win + 1
        bias_mask = bias_mask.at[:valid, i * C:(i + 1) * C].set(
            jnp.broadcast_to(b.reshape(1, C), (valid, C)))

    wfc_p = jnp.zeros((c_pad, n_pad), jnp.float32)
    wfc_p = wfc_p.at[:nW * C, :num_classes].set(wfc).astype(compute_dtype)
    bfc_p = jnp.zeros((1, n_pad), jnp.float32)
    bfc_p = bfc_p.at[:, :num_classes].set(bfc.reshape(1, num_classes))

    grid = (b_pad // tb,)
    out = pl.pallas_call(
        textcnn_kernel,
        out_shape=jax.ShapeDtypeStruct((b_pad, n_pad), jnp.bfloat16),
        grid_spec=pltpu.PrefetchScalarGridSpec(
            num_scalar_prefetch=0,
            grid=grid,
            in_specs=[
                pl.BlockSpec((tb, lout_pad, ku), lambda b: (b, 0, 0)),
                pl.BlockSpec(wconv.shape, lambda b: (0, 0)),
                pl.BlockSpec(bias_mask.shape, lambda b: (0, 0)),
                pl.BlockSpec(wfc_p.shape, lambda b: (0, 0)),
                pl.BlockSpec(bfc_p.shape, lambda b: (0, 0)),
            ],
            out_specs=pl.BlockSpec((tb, n_pad), lambda b: (b, 0)),
        ),
        compiler_params=pltpu.CompilerParams(
            dimension_semantics=("parallel",),
            vmem_limit_bytes=32 * 1024 * 1024,
        ),
    )(slab, wconv, bias_mask, wfc_p, bfc_p)
    return out[:B, :num_classes].astype(jnp.float32)


# ---------------------------------------------------------------------------
# Pure-JAX reference for correctness checking (f32, per-window, matches PyTorch)
# ---------------------------------------------------------------------------
def textcnn_reference(x_emb, conv_ws, conv_bs, wfc, bfc):
    B, L, V = x_emb.shape
    feats = []
    for w, bias in zip(conv_ws, conv_bs):
        win, _, C = w.shape
        lout = L - win + 1
        acc = jnp.zeros((B, lout, C), jnp.float32)
        for k in range(win):
            acc = acc + jnp.einsum("blv,vc->blc", x_emb[:, k:k + lout, :], w[k])
        acc = acc + bias[0][None, None, :]
        feats.append(jnp.max(jnp.maximum(acc, 0.0), axis=1))
    feat = jnp.concatenate(feats, axis=-1)
    return feat @ wfc + bfc[0][None, :]


if __name__ == "__main__":
    # Small, deterministic problem sizes (TB=32, 2-step parallel grid)
    B = 64           # batch
    L = 16           # sequence length
    V = 32           # vec_size (embedding dim)
    VOCAB = 50       # embeddings.shape[0]
    C = 8            # cnn_channels
    WINDOWS = (2, 3, 4)
    NUM_CLASSES = 4

    key = jax.random.PRNGKey(0)
    k_emb, k_ids, k_fc_w, k_fc_b, *k_convs = jax.random.split(key, 4 + 2 * len(WINDOWS))

    # Parameters (deterministic synthetic init)
    emb_table = jax.random.normal(k_emb, (VOCAB, V), jnp.float32) * 0.1
    token_ids = jax.random.randint(k_ids, (B, L), 0, VOCAB)

    conv_ws, conv_bs = [], []
    for i, win in enumerate(WINDOWS):
        kw, kb = k_convs[2 * i], k_convs[2 * i + 1]
        # PyTorch Conv2d weight is (C, 1, win, V); stored here as (win, V, C)
        conv_ws.append(jax.random.normal(kw, (win, V, C), jnp.float32) * 0.05)
        conv_bs.append(jax.random.normal(kb, (1, C), jnp.float32) * 0.05)

    # PyTorch Linear weight is (num_classes, nW*C); stored here as its transpose
    wfc = jax.random.normal(k_fc_w, (len(WINDOWS) * C, NUM_CLASSES), jnp.float32) * 0.05
    bfc = jax.random.normal(k_fc_b, (1, NUM_CLASSES), jnp.float32) * 0.05

    out = textcnn_forward(emb_table, token_ids, conv_ws, conv_bs, wfc, bfc, WINDOWS)
    out = jax.block_until_ready(out)

    # f32 reference (embedding gather in f32, matching the PyTorch module)
    x_emb = jnp.take(emb_table, token_ids, axis=0).astype(jnp.float32)
    ref = textcnn_reference(x_emb, conv_ws, conv_bs, wfc, bfc)
    assert out.shape == (B, NUM_CLASSES)
    assert jnp.allclose(out, ref, atol=1e-2, rtol=5e-2), (
        "max abs diff", float(jnp.max(jnp.abs(out - ref))))

    print("KERNEL_OK")
</pallas_src>

<mosaic_0001>
module attributes {stable_mosaic.version = 11 : i64} {
  func.func @textcnn_kernel(%arg0: i32, %arg1: memref<32x16x128xbf16, #tpu.memory_space<vmem>>, %arg2: memref<128x128xbf16, #tpu.memory_space<vmem>>, %arg3: memref<16x128xf32, #tpu.memory_space<vmem>>, %arg4: memref<128x128xbf16, #tpu.memory_space<vmem>>, %arg5: memref<1x128xf32, #tpu.memory_space<vmem>>, %arg6: memref<32x128xbf16, #tpu.memory_space<vmem>>) attributes {dimension_semantics = [#tpu.dimension_semantics<parallel>], iteration_bounds = array<i64: 2>, scalar_prefetch = 0 : i64, scratch_operands = 0 : i64, tpu.core_type = #tpu.core_type<tc>, window_params = [{transform_indices = @transform_0, window_bounds = array<i64: 32, 16, 128>}, {pipeline_mode = #tpu.pipeline_mode<synchronous>, transform_indices = @transform_1, window_bounds = array<i64: 128, 128>}, {pipeline_mode = #tpu.pipeline_mode<synchronous>, transform_indices = @transform_2, window_bounds = array<i64: 16, 128>}, {pipeline_mode = #tpu.pipeline_mode<synchronous>, transform_indices = @transform_3, window_bounds = array<i64: 128, 128>}, {pipeline_mode = #tpu.pipeline_mode<synchronous>, transform_indices = @transform_4, window_bounds = array<i64: 1, 128>}, {transform_indices = @transform_5, window_bounds = array<i64: 32, 128>}]} {
    %c0 = arith.constant 0 : index
    %c0_0 = arith.constant 0 : index
    %c0_1 = arith.constant 0 : index
    %0 = vector.load %arg1[%c0, %c0_0, %c0_1] : memref<32x16x128xbf16, #tpu.memory_space<vmem>>, vector<32x16x128xbf16>
    %1 = vector.shape_cast %0 : vector<32x16x128xbf16> to vector<512x128xbf16>
    %c0_2 = arith.constant 0 : index
    %c0_3 = arith.constant 0 : index
    %2 = vector.load %arg2[%c0_2, %c0_3] : memref<128x128xbf16, #tpu.memory_space<vmem>>, vector<128x128xbf16>
    %cst = arith.constant dense<0.000000e+00> : vector<512x128xf32>
    %3 = tpu.matmul %1, %2, %cst {dimension_numbers = #tpu.dot_dimension_numbers<[1], [0], [0], [1], [0, 0, 1, 1], [], []>} : vector<512x128xbf16>, vector<128x128xbf16>, vector<512x128xf32> -> vector<512x128xf32>
    %4 = vector.shape_cast %3 : vector<512x128xf32> to vector<32x16x128xf32>
    %c0_4 = arith.constant 0 : index
    %c0_5 = arith.constant 0 : index
    %5 = vector.load %arg3[%c0_4, %c0_5] : memref<16x128xf32, #tpu.memory_space<vmem>>, vector<16x128xf32>
    %6 = vector.shape_cast %5 : vector<16x128xf32> to vector<1x16x128xf32>
    %7 = vector.broadcast %6 : vector<1x16x128xf32> to vector<32x16x128xf32>
    %8 = arith.addf %4, %7 : vector<32x16x128xf32>
    %cst_6 = arith.constant 0.000000e+00 : f32
    %9 = vector.broadcast %cst_6 : f32 to vector<32x16x128xf32>
    %10 = arith.maximumf %8, %9 : vector<32x16x128xf32>
    %cst_7 = arith.constant dense<0xFF800000> : vector<32x128xf32>
    %11 = vector.multi_reduction <maximumf>, %10, %cst_7 [1] : vector<32x16x128xf32> to vector<32x128xf32>
    %12 = arith.truncf %11 : vector<32x128xf32> to vector<32x128xbf16>
    %c0_8 = arith.constant 0 : index
    %c0_9 = arith.constant 0 : index
    %13 = vector.load %arg4[%c0_8, %c0_9] : memref<128x128xbf16, #tpu.memory_space<vmem>>, vector<128x128xbf16>
    %cst_10 = arith.constant dense<0.000000e+00> : vector<32x128xf32>
    %14 = tpu.matmul %12, %13, %cst_10 {dimension_numbers = #tpu.dot_dimension_numbers<[1], [0], [0], [1], [0, 0, 1, 1], [], []>} : vector<32x128xbf16>, vector<128x128xbf16>, vector<32x128xf32> -> vector<32x128xf32>
    %c0_11 = arith.constant 0 : index
    %c0_12 = arith.constant 0 : index
    %15 = vector.load %arg5[%c0_11, %c0_12] : memref<1x128xf32, #tpu.memory_space<vmem>>, vector<1x128xf32>
    %16 = vector.broadcast %15 : vector<1x128xf32> to vector<32x128xf32>
    %17 = arith.addf %14, %16 : vector<32x128xf32>
    %18 = arith.truncf %17 : vector<32x128xf32> to vector<32x128xbf16>
    %c0_13 = arith.constant 0 : index
    %c0_14 = arith.constant 0 : index
    %19 = vector.load %arg6[%c0_13, %c0_14] : memref<32x128xbf16, #tpu.memory_space<vmem>>, vector<32x128xbf16>
    tpu.vector_store %arg6[%c0_13, %c0_14], %18 {strides = array<i32>} : memref<32x128xbf16, #tpu.memory_space<vmem>>, vector<32x128xbf16>,
    return
  }
  func.func @transform_0(%arg0: i32) -> (i32, i32, i32) {
    %c0_i32 = arith.constant 0 : i32
    %c0_i32_0 = arith.constant 0 : i32
    %c0_i32_1 = arith.constant 0 : i32
    return %arg0, %c0_i32, %c0_i32_0 : i32, i32, i32
  }
  func.func @transform_1(%arg0: i32) -> (i32, i32) {
    %c0_i32 = arith.constant 0 : i32
    %c0_i32_0 = arith.constant 0 : i32
    %c0_i32_1 = arith.constant 0 : i32
    return %c0_i32, %c0_i32_0 : i32, i32
  }
  func.func @transform_2(%arg0: i32) -> (i32, i32) {
    %c0_i32 = arith.constant 0 : i32
    %c0_i32_0 = arith.constant 0 : i32
    %c0_i32_1 = arith.constant 0 : i32
    return %c0_i32, %c0_i32_0 : i32, i32
  }
  func.func @transform_3(%arg0: i32) -> (i32, i32) {
    %c0_i32 = arith.constant 0 : i32
    %c0_i32_0 = arith.constant 0 : i32
    %c0_i32_1 = arith.constant 0 : i32
    return %c0_i32, %c0_i32_0 : i32, i32
  }
  func.func @transform_4(%arg0: i32) -> (i32, i32) {
    %c0_i32 = arith.constant 0 : i32
    %c0_i32_0 = arith.constant 0 : i32
    %c0_i32_1 = arith.constant 0 : i32
    return %c0_i32, %c0_i32_0 : i32, i32
  }
  func.func @transform_5(%arg0: i32) -> (i32, i32) {
    %c0_i32 = arith.constant 0 : i32
    %c0_i32_0 = arith.constant 0 : i32
    return %arg0, %c0_i32 : i32, i32
  }
}

</mosaic_0001>

<bundles_post_ra>
// kernel: tpu_custom_call.1
= control target key start
LH: loop header
LB: loop body
LE: loop exit
PB: predicated region body
PF: predicated region fallthrough
CT: control target
= control target key end

     0   :  { %10 = vsyncpa [#allocation3], 0  ;;  %s2779_s0 = inlined_call_operand.hbm [shape: bf16[64,16,128], index: 0, kind: input, shape index: {}]   ;;  %s2780_s1 = inlined_call_operand.hbm [shape: bf16[128,128], index: 1, kind: input, shape index: {}]   ;;  %s2781_s2 = inlined_call_operand.hbm [shape: f32[16,128], index: 2, kind: input, shape index: {}]   ;;  %s2782_s3 = inlined_call_operand.hbm [shape: bf16[128,128], index: 3, kind: input, shape index: {}]   ;;  %s2783_s4 = inlined_call_operand.vmem [shape: f32[1,128], index: 4, kind: input, shape index: {}]   ;;  %s2784_s5 = inlined_call_operand.hbm [shape: bf16[64,128], index: 5, kind: output, shape index: {}]  }
   0x1   :  { %12 = vsyncpa [#allocation3 + $0x1], 0 }
   0x2   :  { %13 = vsyncpa [#allocation6], 0 }
   0x3   :  { %14 = vsyncpa [#allocation9], 0 }
   0x4   :  { %15 = vsyncpa [#allocation4], 0 }
   0x5   :  { %17 = vsyncpa [#allocation4 + $0x1], 0  ;;  %s2255_s18 = smov 0   ;;  %s2257_s19 = smov 0  }
   0x6   :  { %s2259_s20 = smov 0   ;;  %s2261_s21 = smov 0  }
   0x7 LB: > { %s2276_s22 = sadd.s32 4294967295, %s2212_s21   ;;  %s1645_s23 = sadd.s32 4294967294, %s2212_s21   ;;  %s2212_s21 = sphi %s2261_s21, %s2809_s21   ;;  %s2208_s20 = sphi %s2259_s20, %s2808_s20   ;;  %s2204_s19 = sphi %s2257_s19, %s2807_s19   ;;  %s2200_s18 = sphi %s2255_s18, %s2806_s18  }
   0x8   : > { %p43_p0 = scmp.ne.s32.totalorder %s2204_s19, %s2200_s18  ;;  %p2785_p1 = scmp.eq.s32.totalorder %s2276_s22, 0 }
   0x9   : > { %p151_p2 = scmp.eq.s32.totalorder %s2276_s22, 1  ;;  %p157_p3 = scmp.eq.s32.totalorder %s1645_s23, 1 }
   0xa   : > { %p2285_p4 = por %p2785_p1, %p43_p0  ;;  %p1646_p5 = scmp.ge.s32.totalorder %s2212_s21, 1 }
   0xb   : > { %p2290_p6 = por %p157_p3, %p43_p0  ;;  %p164_p7 = scmp.lt.s32.totalorder %s2212_s21, 3 }
   0xc   : > { %s2790_s24 = scalar_select %p2285_p4, 1, 0 }
   0xd   : > { %s2791_s25 = scalar_select %p2290_p6, 1, 0 }
   0xe   : > { %p2295_p8 = pnand %p1646_p5, %p164_p7  ;;  %s2214_s27 = smov [#allocation5]  }
   0xf   : > { %s176_s28 = sshll.u32 %s2214_s27, 4  ;;  %s2215_s30 = smov [#allocation7]   ;;  %s177_s28 = int_to_ptr.vmem [resolvable:$true] %s176_s28 }
  0x10   : > { %s2792_s26 = scalar_select %p2295_p8, 1, 0 }
  0x11   : > { %p1919_p9 = pneg %p2295_p8  ;;  %s189_s6 = sshll.u32 %s2215_s30, 4  ;;  %s190_s6 = int_to_ptr.vmem [resolvable:$true] %s189_s6 }
  0x12   : > { %s2045_s7 = scalar_lea.vmem %s177_s28, 1024  ;;  %p2053_p5 = scmp.lt.s32.totalorder %s177_s28, %s177_s28 }
  0x13   : > { %p2304_p11 = pnand %p1919_p9, %p2785_p1  ;;  %p2046_p13 = scmp.ne.s32.totalorder %s177_s28, %s2045_s7 }
  0x14   : > { %p2054_p7 = scmp.lt.s32.totalorder %s2045_s7, %s2045_s7 }
  0x15   : > { %p2036_p12 = pneg %p2304_p11 }
  0x16   : > { %p2055_p10 = por %p2054_p7, %p2053_p5 }
  0x17   : > { %p2048_p0 = pnand %p2046_p13, %p2036_p12 }
  0x19   : > { %p2049_p3 = pneg %p2048_p0 }
  0x1b   : > { %p2056_p9 = pnand %p2055_p10, %p2049_p3 }
  0x1d   : > { %2059 = shalt.err (!%p2056_p9)
}
  0x1e   : > { %s2786_s8 = smov 64   ;;  %s2217_s9 = smov 4  }
  0x1f   : > { %1922 = dma.hbm_to_vmem [thread:$0]  (!%p2304_p11), %s2780_s1, 1024, %s177_s28, [#allocation6], %s2786_s8, %s2786_s8, %s2217_s9  }
  0x20   : > { %s2071_s12 = scalar_lea.vmem %s190_s6, 256  ;;  %p2079_p10 = scmp.lt.s32.totalorder %s190_s6, %s190_s6 }
  0x21   : > { %p2072_p13 = scmp.ne.s32.totalorder %s190_s6, %s2071_s12  ;;  %p2080_p3 = scmp.lt.s32.totalorder %s2071_s12, %s2071_s12 }
  0x23   : > { %p2074_p0 = pnand %p2072_p13, %p2036_p12  ;;  %p2081_p7 = por %p2080_p3, %p2079_p10 }
  0x25   : > { %p2075_p5 = pneg %p2074_p0 }
  0x27   : > { %p2082_p9 = pnand %p2081_p7, %p2075_p5 }
  0x29   : > { %2085 = shalt.err (!%p2082_p9)
}
  0x2a   : > { %s2218_s13 = smov 128   ;;  %s2219_s14 = smov 8  }
  0x2b   : > { %1925 = dma.hbm_to_vmem [thread:$0]  (!%p2304_p11), %s2781_s2, 256, %s190_s6, [#allocation6], %s2218_s13, %s2218_s13, %s2219_s14  }
  0x2c   : > { %s2220_s17 = smov [#allocation8]   ;;  %s2330_s27 = sadd.s32 1, %s2212_s21  }
  0x2d   : > { %s202_s23 = sshll.u32 %s2220_s17, 4  ;;  %s203_s23 = int_to_ptr.vmem [resolvable:$true] %s202_s23 }
  0x2e   : > { %s2097_s28 = scalar_lea.vmem %s203_s23, 1024  ;;  %p2105_p10 = scmp.lt.s32.totalorder %s203_s23, %s203_s23 }
  0x2f   : > { %p2098_p13 = scmp.ne.s32.totalorder %s203_s23, %s2097_s28  ;;  %p2106_p3 = scmp.lt.s32.totalorder %s2097_s28, %s2097_s28 }
  0x31   : > { %p2100_p0 = pnand %p2098_p13, %p2036_p12  ;;  %p2107_p7 = por %p2106_p3, %p2105_p10 }
  0x33   : > { %p2101_p5 = pneg %p2100_p0 }
  0x35   : > { %p2108_p9 = pnand %p2107_p7, %p2101_p5 }
  0x37   : > { %2111 = shalt.err (!%p2108_p9)
}
  0x38   : > { %1928 = dma.hbm_to_vmem [thread:$0]  (!%p2304_p11), %s2782_s3, 1024, %s203_s23, [#allocation9], %s2786_s8, %s2786_s8, %s2217_s9  }
  0x39   : > { %s27_s7 = ssub.s32 %s2212_s21, %s2330_s27  ;;  %s30_s29 = sadd.s32 1, %s2208_s20 }
  0x3a   : > { %p28_p12 = scmp.eq.s32.totalorder %s27_s7, 0  ;;  %p37_p13 = scmp.ne.s32.totalorder %s2208_s20, %s2204_s19 }
  0x3b   : > { %p38_p0 = scmp.eq.s32.totalorder %s2212_s21, 0  ;;  %p1940_p5 = scmp.lt.s32.totalorder %s2212_s21, 2 }
  0x3c   : > { %s2351_s10 = scalar_select %p28_p12, %s2208_s20, %s30_s29  }
  0x3d   : > { %p39_p10 = por %p38_p0, %p37_p13  ;;  %p2355_p3 = por %p151_p2, %p37_p13 }
  0x3e   : > { %s219_s12 = sand.u32 1, %s2208_s20   ;;  %s1720_s13 = sshll.u32 %s2212_s21, 12 }
  0x3f   : > { %s2794_s11 = scalar_select %p2355_p3, 1, 0 }
  0x40   : > { %s1651_s14 = sshll.u32 %s219_s12, 8  ;;  %s2364_s17 = scalar_lea.hbm %s2779_s0, %s1720_s13 }
  0x41   : > { %s223_s23 = scalar_lea.vmem [#allocation2], %s1651_s14  ;;  %p2366_p11 = pnand %p1940_p5, %p39_p10 }
  0x42   : > { %s231_s28 = sshll.u32 %s223_s23, 4  ;;  %s2372_s6 = scalar_lea.sflag [#allocation3], %s219_s12  ;;  %s2370_s28 = int_to_ptr.vmem [resolvable:$true] %s231_s28 }
  0x43   : > { %s2112_s7 = scalar_lea.hbm %s2364_s17, 4096  ;;  %p2114_p7 = pneg %p2366_p11 }
  0x44   : > { %p2113_p2 = scmp.ne.s32.totalorder %s2364_s17, %s2112_s7  ;;  %s2117_s14 = scalar_lea.hbm %s2779_s0, 8192 }
  0x45   : > { %p2118_p13 = scmp.lt.s32.totalorder %s2364_s17, %s2779_s0  ;;  %p2119_p0 = scmp.lt.s32.totalorder %s2117_s14, %s2112_s7 }
  0x46   : > { %p2115_p9 = pnand %p2114_p7, %p2113_p2 }
  0x47   : > { %p2120_p5 = por %p2119_p0, %p2118_p13 }
  0x48   : > { %p2116_p12 = pneg %p2115_p9 }
  0x4a   : > { %p2121_p10 = pnand %p2120_p5, %p2116_p12 }
  0x4c   : > { %2124 = shalt.err (!%p2121_p10)
}
  0x4d   : > { %s2125_s12 = scalar_lea.vmem %s2370_s28, 4096  ;;  %s2221_s23 = smov [#allocation2]  }
  0x4e   : > { %p2126_p1 = scmp.ne.s32.totalorder %s2370_s28, %s2125_s12  ;;  %s2130_s8 = sshll.u32 %s2221_s23, 4  ;;  %s2131_s8 = int_to_ptr.vmem [resolvable:$false] %s2130_s8 }
  0x4f   : > { %s2132_s29 = scalar_lea.vmem %s2131_s8, 8192  ;;  %p2133_p9 = scmp.lt.s32.totalorder %s2370_s28, %s2131_s8 }
  0x50   : > { %p2128_p6 = pnand %p2126_p1, %p2114_p7  ;;  %p2134_p3 = scmp.lt.s32.totalorder %s2132_s29, %s2125_s12 }
  0x52   : > { %p2129_p2 = pneg %p2128_p6  ;;  %p2135_p4 = por %p2134_p3, %p2133_p9 }
  0x54   : > { %p2136_p8 = pnand %p2135_p4, %p2129_p2 }
  0x56   : > { %2139 = shalt.err (!%p2136_p8)
}
  0x57   : > { %s2796_s7 = smov 64   ;;  %p2797_p1 = scmp.ne.s32.totalorder %s2792_s26, 0 }
  0x58   : > { %1932 = dma.hbm_to_vmem [thread:$0]  (!%p2366_p11), %s2364_s17, 4096, %s2370_s28, %s2372_s6, %s2796_s7, %s2796_s7, %s2217_s9  }
  0x59   : > { %243 = sbr.rel (%p2797_p1) target bundleno = 666 (0x29a), region = 40  ;;  %s2399_s13 = sand.u32 (!%p2797_p1), 1, %s2204_s19  }
  0x5a   : > { %s1656_s8 = sshll.u32 (!%p2797_p1), %s2399_s13, 8  ;;  %s246_s14 = scalar_lea.sflag (!%p2797_p1), [#allocation3], %s2399_s13 }
  0x5b   : > { %s2403_s15 = scalar_lea.vmem (!%p2797_p1), [#allocation2], %s1656_s8  ;;  %p2798_p4 = scmp.ne.s32.totalorder (!%p2797_p1), %s2790_s24, 0 }
  0x5e   : > { %2183 = dma.done.wait (%p2798_p4), %s246_s14, 4096  }
  0x5f   : > { %2185 = vsyncadd (%p2798_p4), %s246_s14, 4294963200  ;;  %p2799_p6 = scmp.eq.s32.totalorder %s2276_s22, 0 }
  0x61   : > { %2187 = dma.done.wait (%p2799_p6), [#allocation6], 1280   ;;  %p2800_p8 = pmov %p2799_p6 }
  0x62   : > { %p2801_p3 = pmov %p2799_p6 }
  0x63   : > { %2189 = vsyncadd (%p2800_p8), [#allocation6], 4294966016 }
  0x64   : > { %2191 = dma.done.wait (%p2801_p3), [#allocation9], 1024   ;;  %p2802_p11 = pmov %p2801_p3 }
  0x65   : > { %v1986_v0 = vld [vmem:[#allocation5 + $0x38] sm:$0xff]   ;;  %v1987_v1 = vld [vmem:[#allocation5 + $0x30] sm:$0xff]   ;;  %v1988_v2 = vld [vmem:[#allocation5 + $0x28] sm:$0xff]   ;;  %vm1373_vm0 = vcmask 1041409   ;;  %vm1375_vm1 = vcmask 1042434   ;;  %vm1377_vm2 = vcmask 1043459  }
  0x66   : > { %2193 = vsyncadd (%p2802_p11), [#allocation9], 4294966272  ;;  %1787 = vmatprep.subr.bf16.mxu0 %v1986_v0  ;;  %1887 = vmatprep.subr.bf16.mxu1 %v1986_v0  ;;  %v1989_v3 = vld [vmem:[#allocation5 + $0x20] sm:$0xff]   ;;  %v1995_v5 = vld [vmem:[%s2403_s15 + $0x90] sm:$0xff]   ;;  %vm1379_vm3 = vcmask 1044484   ;;  %vm1381_vm4 = vcmask 1045509  }
  0x67   : > { %1788 = vmatpush3.bf16.msra.mxu0 %v1986_v0  ;;  %1895 = vmatpush3.bf16.msra.mxu1 %v1986_v0  ;;  %v1994_v4 = vld [vmem:[%s2403_s15] sm:$0xff]   ;;  %v1990_v6 = vld [vmem:[#allocation5 + $0x18] sm:$0xff]   ;;  %v1991_v7 = vld [vmem:[#allocation5 + $0x10] sm:$0xff]   ;;  %vm1383_vm5 = vcmask 1046534   ;;  %vm1385_vm6 = vcmask 1047559   ;;  %s1660_s24 = sshll.u32 %s2399_s13, 4 }
  0x68   : > { %1789 = vmatprep.subr.bf16.mxu0 %v1987_v1  ;;  %1888 = vmatprep.subr.bf16.mxu1 %v1987_v1  ;;  %v1992_v8 = vld [vmem:[#allocation5 + $0x8] sm:$0xff]   ;;  %v1993_v9 = vld [vmem:[#allocation5] sm:$0xff]   ;;  %v1997_v11 = vld [vmem:[%s2403_s15 + $0x98] sm:$0xff]   ;;  %s287_s17 = scalar_lea.vmem [#allocation10], %s1660_s24  ;;  %s1725_s30 = sshll.u32 %s2276_s22, 8 }
  0x69   : > { %1803 = vmatprep.mubr.bf16.mxu0 %v1994_v4  ;;  %1839 = vmatprep.mubr.bf16.mxu1 %v1995_v5  ;;  %v1996_v10 = vld [vmem:[%s2403_s15 + $0x8] sm:$0xff]   ;;  %v1998_v12 = vld [vmem:[%s2403_s15 + $0x10] sm:$0xff]   ;;  %v1999_v13 = vld [vmem:[%s2403_s15 + $0xa0] sm:$0xff]   ;;  %s1543_s28 = sshll.u32 %s287_s17, 4  ;;  %s2736_s12 = scalar_lea.hbm %s2784_s5, %s1725_s30  ;;  %s2731_s28 = int_to_ptr.vmem [resolvable:$true] %s1543_s28 }
  0x6a   : > { %v2000_v14 = vld [vmem:[%s2403_s15 + $0x18] sm:$0xff]   ;;  %v2001_v15 = vld [vmem:[%s2403_s15 + $0xa8] sm:$0xff]   ;;  %v2002_v16 = vld [vmem:[%s2403_s15 + $0x20] sm:$0xff]   ;;  %s1530_s23 = scalar_lea.sflag [#allocation4], %s2399_s13  ;;  %s2140_s29 = scalar_lea.vmem %s2731_s28, 256 }
  0x6b   : > { %1790 = vmatpush3.bf16.msra.mxu0 %v1987_v1  ;;  %1896 = vmatpush3.bf16.msra.mxu1 %v1987_v1  ;;  %v2003_v17 = vld [vmem:[%s2403_s15 + $0xb0] sm:$0xff]   ;;  %v2004_v18 = vld [vmem:[%s2403_s15 + $0x28] sm:$0xff]   ;;  %v2005_v19 = vld [vmem:[%s2403_s15 + $0xb8] sm:$0xff]   ;;  %p2141_p7 = scmp.ne.s32.totalorder %s2731_s28, %s2140_s29  ;;  %p2803_p12 = scmp.ne.s32.totalorder %s2794_s11, 0 }
  0x6c   : > { %1791 = vmatprep.subr.bf16.mxu0 %v1988_v2  ;;  %1889 = vmatprep.subr.bf16.mxu1 %v1988_v2  ;;  %v2006_v20 = vld [vmem:[%s2403_s15 + $0x30] sm:$0xff]   ;;  %v2007_v21 = vld [vmem:[%s2403_s15 + $0xc0] sm:$0xff]   ;;  %v2008_v22 = vld [vmem:[%s2403_s15 + $0x38] sm:$0xff]   ;;  %s2222_s22 = smov [#allocation10]  }
  0x6d   : > { %v2009_v23 = vld [vmem:[%s2403_s15 + $0xc8] sm:$0xff]   ;;  %v2010_v24 = vld [vmem:[%s2403_s15 + $0x40] sm:$0xff]   ;;  %v2011_v25 = vld [vmem:[%s2403_s15 + $0xd0] sm:$0xff]   ;;  %p2142_p13 = pnand %p2141_p7, %p2803_p12  ;;  %s2144_s7 = sshll.u32 %s2222_s22, 4  ;;  %s2145_s7 = int_to_ptr.vmem [resolvable:$false] %s2144_s7 }
  0x6e   : > { %v2012_v26 = vld [vmem:[%s2403_s15 + $0x48] sm:$0xff]   ;;  %v2013_v27 = vld [vmem:[%s2403_s15 + $0xd8] sm:$0xff]   ;;  %v2014_v28 = vld [vmem:[%s2403_s15 + $0x50] sm:$0xff]   ;;  %s2146_s8 = scalar_lea.vmem %s2145_s7, 512  ;;  %p2147_p5 = scmp.lt.s32.totalorder %s2731_s28, %s2145_s7 }
  0x6f   : > { %1792 = vmatpush3.bf16.msra.mxu0 %v1988_v2  ;;  %1897 = vmatpush3.bf16.msra.mxu1 %v1988_v2  ;;  %v2015_v29 = vld [vmem:[%s2403_s15 + $0xe0] sm:$0xff]   ;;  %v2016_v30 = vld [vmem:[%s2403_s15 + $0x58] sm:$0xff]   ;;  %v2017_v31 = vld [vmem:[%s2403_s15 + $0xe8] sm:$0xff]   ;;  %p2143_p0 = pneg %p2142_p13  ;;  %p2148_p10 = scmp.lt.s32.totalorder %s2146_s8, %s2140_s29 }
  0x70   : > { %1793 = vmatprep.subr.bf16.mxu0 %v1989_v3  ;;  %1890 = vmatprep.subr.bf16.mxu1 %v1989_v3  ;;  %v2018_v32 = vld [vmem:[%s2403_s15 + $0x60] sm:$0xff]   ;;  %v2019_v33 = vld [vmem:[%s2403_s15 + $0xf0] sm:$0xff]   ;;  %v2020_v34 = vld [vmem:[%s2403_s15 + $0x68] sm:$0xff]  }
  0x71   : > { %v2021_v35 = vld [vmem:[%s2403_s15 + $0xf8] sm:$0xff]   ;;  %v2022_v36 = vld [vmem:[%s2403_s15 + $0x70] sm:$0xff]   ;;  %v2024_v38 = vld [vmem:[%s2403_s15 + $0x80] sm:$0xff]   ;;  %p2149_p2 = por %p2148_p10, %p2147_p5 }
  0x72   : > { %v2023_v37 = vld [vmem:[%s2403_s15 + $0x78] sm:$0xff]   ;;  %v2025_v39 = vld [vmem:[%s2403_s15 + $0x88] sm:$0xff]   ;;  %v2027_v41 = vld [vmem:[#allocation8 + $0x30] sm:$0xff]  }
  0x73   : > { %1794 = vmatpush3.bf16.msra.mxu0 %v1989_v3  ;;  %1898 = vmatpush3.bf16.msra.mxu1 %v1989_v3  ;;  %v2026_v40 = vld [vmem:[#allocation8 + $0x38] sm:$0xff]   ;;  %v2028_v42 = vld [vmem:[#allocation8 + $0x28] sm:$0xff]   ;;  %v2029_v43 = vld [vmem:[#allocation8 + $0x20] sm:$0xff]   ;;  %p2150_p9 = pnand %p2149_p2, %p2143_p0 }
  0x74   : > { %1795 = vmatprep.subr.bf16.mxu0 %v1990_v6  ;;  %1891 = vmatprep.subr.bf16.mxu1 %v1990_v6  ;;  %v2030_v44 = vld [vmem:[#allocation8 + $0x18] sm:$0xff]   ;;  %v2031_v45 = vld [vmem:[#allocation8 + $0x10] sm:$0xff]   ;;  %v2032_v46 = vld [vmem:[#allocation8 + $0x8] sm:$0xff]  }
  0x75   : > { %v2033_v47 = vld [vmem:[#allocation8] sm:$0xff]   ;;  %v2449_v48 = vld [vmem:[#allocation7] sm:$0xff]  ;;  %v2453_v55 = vld [vmem:[#allocation7 + $0x8] sm:$0xff] }
  0x77   : > { %1796 = vmatpush3.bf16.msra.mxu0 %v1990_v6  ;;  %1899 = vmatpush3.bf16.msra.mxu1 %v1990_v6 }
  0x78   : > { %1797 = vmatprep.subr.bf16.mxu0 %v1991_v7  ;;  %1892 = vmatprep.subr.bf16.mxu1 %v1991_v7 }
  0x7b   : > { %1798 = vmatpush3.bf16.msra.mxu0 %v1991_v7  ;;  %1900 = vmatpush3.bf16.msra.mxu1 %v1991_v7 }
  0x7c   : > { %1799 = vmatprep.subr.bf16.mxu0 %v1992_v8  ;;  %1893 = vmatprep.subr.bf16.mxu1 %v1992_v8 }
  0x7f   : > { %1800 = vmatpush3.bf16.msra.mxu0 %v1992_v8  ;;  %1901 = vmatpush3.bf16.msra.mxu1 %v1992_v8 }
  0x80   : > { %1801 = vmatprep.subr.bf16.mxu0 %v1993_v9  ;;  %1894 = vmatprep.subr.bf16.mxu1 %v1993_v9 }
  0x83   : > { %1802 = vmatpush3.bf16.msra.mxu0 %v1993_v9  ;;  %1902 = vmatpush3.bf16.msra.mxu1 %v1993_v9 }
  0x84   : > { %1867 = vmatprep.subr.bf16.mxu1 %v2026_v40 }
  0x86   : > { %1804 = vmatmul.mubr.bf16.vlgmr.msra.gmra.mxu0 %v1996_v10  ;;  %1840 = vmatmul.mubr.bf16.vlgmr.msra.gmra.mxu1 %v1997_v11 }
  0x87   : > { %1807 = vmatprep.mubr.bf16.mxu0 %v1998_v12  ;;  %1843 = vmatprep.mubr.bf16.mxu1 %v1999_v13 }
  0x88   : > { %1868 = vmatpush3.bf16.msra.mxu1 %v2026_v40 }
  0x89   : > { %1869 = vmatprep.subr.bf16.mxu1 %v2027_v41 }
  0x8c   : > { %1870 = vmatpush3.bf16.msra.mxu1 %v2027_v41 }
  0x8d   : > { %1871 = vmatprep.subr.bf16.mxu1 %v2028_v42 }
  0x8e   : > { %1808 = vmatmul.mubr.bf16.gmra.mxu0 %v2000_v14  ;;  %1844 = vmatmul.mubr.bf16.gmra.mxu1 %v2001_v15 }
  0x8f   : > { %1811 = vmatprep.mubr.bf16.mxu0 %v2002_v16  ;;  %1847 = vmatprep.mubr.bf16.mxu1 %v2003_v17 }
  0x90   : > { %1872 = vmatpush3.bf16.msra.mxu1 %v2028_v42 }
  0x91   : > { %1873 = vmatprep.subr.bf16.mxu1 %v2029_v43 }
  0x94   : > { %1874 = vmatpush3.bf16.msra.mxu1 %v2029_v43 }
  0x95   : > { %1875 = vmatprep.subr.bf16.mxu1 %v2030_v44 }
  0x96   : > { %1812 = vmatmul.mubr.bf16.gmra.mxu0 %v2004_v18  ;;  %1848 = vmatmul.mubr.bf16.gmra.mxu1 %v2005_v19 }
  0x97   : > { %1815 = vmatprep.mubr.bf16.mxu0 %v2006_v20  ;;  %1851 = vmatprep.mubr.bf16.mxu1 %v2007_v21 }
  0x98   : > { %1876 = vmatpush3.bf16.msra.mxu1 %v2030_v44 }
  0x99   : > { %1877 = vmatprep.subr.bf16.mxu1 %v2031_v45 }
  0x9c   : > { %1878 = vmatpush3.bf16.msra.mxu1 %v2031_v45 }
  0x9d   : > { %1879 = vmatprep.subr.bf16.mxu1 %v2032_v46 }
  0x9e   : > { %1816 = vmatmul.mubr.bf16.gmra.mxu0 %v2008_v22  ;;  %1852 = vmatmul.mubr.bf16.gmra.mxu1 %v2009_v23 }
  0x9f   : > { %1819 = vmatprep.mubr.bf16.mxu0 %v2010_v24  ;;  %1855 = vmatprep.mubr.bf16.mxu1 %v2011_v25 }
  0xa0   : > { %1880 = vmatpush3.bf16.msra.mxu1 %v2032_v46 }
  0xa1   : > { %1881 = vmatprep.subr.bf16.mxu1 %v2033_v47 }
  0xa4   : > { %1882 = vmatpush3.bf16.msra.mxu1 %v2033_v47 }
  0xa6   : > { %1820 = vmatmul.mubr.bf16.gmra.mxu0 %v2012_v26  ;;  %1856 = vmatmul.mubr.bf16.gmra.mxu1 %v2013_v27 }
  0xa7   : > { %1823 = vmatprep.mubr.bf16.mxu0 %v2014_v28  ;;  %1859 = vmatprep.mubr.bf16.mxu1 %v2015_v29 }
  0xae   : > { %1824 = vmatmul.mubr.bf16.gmra.mxu0 %v2016_v30  ;;  %1860 = vmatmul.mubr.bf16.gmra.mxu1 %v2017_v31 }
  0xaf   : > { %1827 = vmatprep.mubr.bf16.mxu0 %v2018_v32  ;;  %1863 = vmatprep.mubr.bf16.mxu1 %v2019_v33 }
  0xb6   : > { %1828 = vmatmul.mubr.bf16.gmra.mxu0 %v2020_v34  ;;  %1864 = vmatmul.mubr.bf16.gmra.mxu1 %v2021_v35 }
  0xb7   : > { %1831 = vmatprep.mubr.bf16.mxu0 %v2022_v36 }
  0xbe   : > { %1832 = vmatmul.mubr.bf16.gmra.mxu0 %v2023_v37 }
  0xbf   : > { %1835 = vmatprep.mubr.bf16.mxu0 %v2024_v38 }
  0xc6   : > { %1836 = vmatmul.mubr.bf16.gmra.mxu0 %v2025_v39 }
 0x146   : > { %v1805_v49 = vpop.f32.mrf.mxu0  ;;  %v1841_v50 = vpop.f32.mrf.mxu1 }
 0x147   : > { %v940_v51 = vadd.f32 %v1841_v50, %v2449_v48  ;;  %v904_v52 = vadd.f32 %v1805_v49, %v2449_v48 }
 0x148   : > { %v645_v53 = vpop.f32.mrf.mxu0  ;;  %v789_v54 = vpop.f32.mrf.mxu1 }
 0x149   : > { %v938_v56 = vadd.f32 %v2449_v48, %v789_v54  ;;  %v902_v57 = vadd.f32 %v2449_v48, %v645_v53  ;;  %v1004_v60 = vmax.f32 %v940_v51, 0.0  ;;  %v968_v63 = vmax.f32 %v904_v52, 0.0 }
 0x14a   : > { %v1806_v58 = vpop.f32.mrf.mxu0  ;;  %v1842_v59 = vpop.f32.mrf.mxu1 }
 0x14b   : > { %v905_v61 = vadd.f32 %v1806_v58, %v2453_v55  ;;  %v941_v62 = vadd.f32 %v1842_v59, %v2453_v55  ;;  %v1002_v0 = vmax.f32 %v938_v56, 0.0  ;;  %v966_v7 = vmax.f32 %v902_v57, 0.0 }
 0x14c   : > { %v648_v1 = vpop.f32.mrf.mxu0  ;;  %v792_v2 = vpop.f32.mrf.mxu1 }
 0x14d   : > { %v969_v3 = vmax.f32 %v905_v61, 0.0  ;;  %v1005_v4 = vmax.f32 %v941_v62, 0.0  ;;  %v903_v5 = vadd.f32 %v2453_v55, %v648_v1  ;;  %v939_v6 = vadd.f32 %v2453_v55, %v792_v2 }
 0x14e   : > { %v1809_v8 = vpop.f32.mrf.mxu0  ;;  %v1845_v9 = vpop.f32.mrf.mxu1 }
 0x14f   : > { %v1037_v10 = vmax.f32 %v968_v63, %v969_v3  ;;  %v1163_v11 = vmax.f32 %v1004_v60, %v1005_v4  ;;  %v967_v12 = vmax.f32 %v903_v5, 0.0  ;;  %v1003_v13 = vmax.f32 %v939_v6, 0.0 }
 0x150   : > { %v908_v14 = vadd.f32 %v1809_v8, %v2449_v48  ;;  %v661_v15 = vpop.f32.mrf.mxu0  ;;  %v805_v16 = vpop.f32.mrf.mxu1  ;;  %v944_v32 = vadd.f32 %v1845_v9, %v2449_v48 }
 0x151   : > { %v1038_v17 = vrot.slane %v1037_v10, 4  ;;  %v1164_v18 = vrot.slane %v1163_v11, 4  ;;  %v1030_v19 = vmax.f32 %v966_v7, %v967_v12  ;;  %v1156_v20 = vmax.f32 %v1002_v0, %v1003_v13 }
 0x152   : > { %v1810_v21 = vpop.f32.mrf.mxu0  ;;  %v1846_v22 = vpop.f32.mrf.mxu1  ;;  %v906_v26 = vadd.f32 %v2449_v48, %v661_v15  ;;  %v972_v31 = vmax.f32 %v908_v14, 0.0  ;;  %v942_v41 = vadd.f32 %v2449_v48, %v805_v16  ;;  %v1008_v50 = vmax.f32 %v944_v32, 0.0 }
 0x153   : > { %v1039_v23 = vmax.f32 %v1037_v10, %v1038_v17  ;;  %v1165_v24 = vmax.f32 %v1163_v11, %v1164_v18  ;;  %v1031_v25 = vrot.slane %v1030_v19, 4  ;;  %v909_v27 = vadd.f32 %v1810_v21, %v2453_v55 }
 0x154   : > { %v664_v28 = vpop.f32.mrf.mxu0  ;;  %v808_v29 = vpop.f32.mrf.mxu1  ;;  %v1157_v30 = vrot.slane %v1156_v20, 4  ;;  %v945_v33 = vadd.f32 %v1846_v22, %v2453_v55  ;;  %v970_v42 = vmax.f32 %v906_v26, 0.0  ;;  %v1006_v59 = vmax.f32 %v942_v41, 0.0 }
 0x155   : > { %v1040_v34 = vrot.slane %v1039_v23, 2  ;;  %v1032_v35 = vmax.f32 %v1030_v19, %v1031_v25  ;;  %v973_v36 = vmax.f32 %v909_v27, 0.0  ;;  %v907_v37 = vadd.f32 %v2453_v55, %v664_v28 }
 0x156   : > { %v1813_v38 = vpop.f32.mrf.mxu0  ;;  %v1849_v39 = vpop.f32.mrf.mxu1  ;;  %v1166_v40 = vrot.slane %v1165_v24, 2  ;;  %v943_v45 = vadd.f32 %v2453_v55, %v808_v29  ;;  %v1158_v49 = vmax.f32 %v1156_v20, %v1157_v30  ;;  %v1009_v53 = vmax.f32 %v945_v33, 0.0 }
 0x157   : > { %v1051_v43 = vmax.f32 %v972_v31, %v973_v36  ;;  %v971_v44 = vmax.f32 %v907_v37, 0.0  ;;  %v1041_v51 = vmax.f32 %v1039_v23, %v1040_v34  ;;  %v1033_v52 = vrot.slane %v1032_v35, 2 }
 0x158   : > { %v677_v46 = vpop.f32.mrf.mxu0  ;;  %v821_v47 = vpop.f32.mrf.mxu1  ;;  %v1167_v58 = vmax.f32 %v1165_v24, %v1166_v40  ;;  %v1007_v62 = vmax.f32 %v943_v45, 0.0  ;;  %v1159_v1 = vrot.slane %v1158_v49, 2  ;;  %v1177_v4 = vmax.f32 %v1008_v50, %v1009_v53 }
 0x159   : > { %v1044_v54 = vmax.f32 %v970_v42, %v971_v44  ;;  %v1052_v60 = vrot.slane %v1051_v43, 4  ;;  %v1042_v2 = vrot.slane %v1041_v51, 1  ;;  %v1034_v3 = vmax.f32 %v1032_v35, %v1033_v52 }
 0x15a   : > { %v1814_v56 = vpop.f32.mrf.mxu0  ;;  %v1850_v57 = vpop.f32.mrf.mxu1  ;;  %v1168_v8 = vrot.slane %v1167_v58, 1  ;;  %v1170_v11 = vmax.f32 %v1006_v59, %v1007_v62  ;;  %v1160_v14 = vmax.f32 %v1158_v49, %v1159_v1  ;;  %v1178_v17 = vrot.slane %v1177_v4, 4 }
 0x15b   : > { %v1045_v61 = vrot.slane %v1044_v54, 4  ;;  %v1053_v9 = vmax.f32 %v1051_v43, %v1052_v60  ;;  %v2469_v15 = vmax.f32 %v1041_v51, %v1042_v2  ;;  %v1035_v16 = vrot.slane %v1034_v3, 1 }
 0x15c   : > { %v680_v63 = vpop.f32.mrf.mxu0  ;;  %v824_v0 = vpop.f32.mrf.mxu1  ;;  %v912_v18 = vadd.f32 %v1813_v38, %v2449_v48  ;;  %v2472_v20 = vmax.f32 %v1167_v58, %v1168_v8  ;;  %v948_v21 = vadd.f32 %v1849_v39, %v2449_v48  ;;  %v1171_v24 = vrot.slane %v1170_v11, 4 }
 0x15d   : > { %v1046_v5 = vmax.f32 %v1044_v54, %v1045_v61  ;;  %v1054_v22 = vrot.slane %v1053_v9, 2  ;;  %v910_v25 = vadd.f32 %v2449_v48, %v677_v46  ;;  %v1161_v28 = vrot.slane %v1160_v14, 1 }
 0x15e   : > { %v1817_v6 = vpop.f32.mrf.mxu0  ;;  %v1853_v7 = vpop.f32.mrf.mxu1  ;;  %v946_v29 = vadd.f32 %v2449_v48, %v821_v47  ;;  %v913_v30 = vadd.f32 %v1814_v56, %v2453_v55  ;;  %v949_v31 = vadd.f32 %v1850_v57, %v2453_v55  ;;  %v1255_v32 = vpack.c.bf16 %v2469_v15, %v2469_v15 }
 0x15f   : > { %v1047_v10 = vrot.slane %v1046_v5, 2  ;;  %v2481_v33 = vmax.f32 %v1034_v3, %v1035_v16  ;;  %v2483_v34 = vmax.f32 %v1177_v4, %v1178_v17  ;;  %v976_v35 = vmax.f32 %v912_v18, 0.0 }
 0x160   : > { %v693_v12 = vpop.f32.mrf.mxu0  ;;  %v837_v13 = vpop.f32.mrf.mxu1  ;;  %v1012_v37 = vmax.f32 %v948_v21, 0.0  ;;  %v977_v38 = vmax.f32 %v913_v30, 0.0  ;;  %v1013_v39 = vmax.f32 %v949_v31, 0.0  ;;  %v911_v40 = vadd.f32 %v2453_v55, %v680_v63 }
 0x161   : > { %v1048_v23 = vmax.f32 %v1046_v5, %v1047_v10  ;;  %v2488_v41 = vmax.f32 %v1053_v9, %v1054_v22  ;;  %v1172_v43 = vmax.f32 %v1170_v11, %v1171_v24  ;;  %v974_v44 = vmax.f32 %v910_v25, 0.0 }
 0x162   : > { %v1818_v19 = vpop.f32.mrf.mxu0  ;;  %v1854_v26 = vpop.f32.mrf.mxu1  ;;  %v1010_v47 = vmax.f32 %v946_v29, 0.0  ;;  %v1065_v49 = vmax.f32 %v976_v35, %v977_v38  ;;  %v975_v50 = vmax.f32 %v911_v40, 0.0  ;;  %v947_v51 = vadd.f32 %v2453_v55, %v824_v0 }
 0x163   : > { %v1049_v42 = vrot.slane %v1048_v23, 1  ;;  %v1254_v52 = vpack.c.bf16 %v2481_v33, %v2481_v33  ;;  %v2495_v53 = vmax.f32 %v1160_v14, %v1161_v28  ;;  %v1180_v54 = vrot.slane %v2483_v34, 2 }
 0x164   : > { %v696_v27 = vpop.f32.mrf.mxu0  ;;  %v840_v45 = vpop.f32.mrf.mxu1  ;;  %v952_v56 = vadd.f32 %v1853_v7, %v2449_v48  ;;  %v1066_v58 = vrot.slane %v1065_v49, 4  ;;  %v1191_v59 = vmax.f32 %v1012_v37, %v1013_v39  ;;  %v1058_v60 = vmax.f32 %v974_v44, %v975_v50 }
 0x165   : > { %v1011_v61 = vmax.f32 %v947_v51, 0.0  ;;  %v1056_v62 = vrot.slane %v2488_v41, 1  ;;  %v2502_v63 = vmax.f32 %v1048_v23, %v1049_v42  ;;  %v1173_v0 = vrot.slane %v1172_v43, 2 }
 0x166   : > { %v2485_v36 = vpop.f32.mrf.mxu0  ;;  %v916_v1 = vadd.f32 %v1817_v6, %v2449_v48  ;;  %v2505_v2 = vpop.f32.mrf.mxu1  ;;  %v1067_v4 = vmax.f32 %v1065_v49, %v1066_v58  ;;  %v1059_v5 = vrot.slane %v1058_v60, 4  ;;  %v914_v8 = vadd.f32 %v2449_v48, %v693_v12 }
 0x167   : > { %v1184_v7 = vmax.f32 %v1010_v47, %v1011_v61  ;;  %v1016_v9 = vmax.f32 %v952_v56, 0.0  ;;  %v950_v10 = vadd.f32 %v2449_v48, %v837_v13  ;;  %v917_v11 = vadd.f32 %v1818_v19, %v2453_v55 }
 0x168   : > { %v2490_v46 = vpop.f32.mrf.mxu0  ;;  %v953_v14 = vadd.f32 %v1854_v26, %v2453_v55  ;;  %v1068_v6 = vrot.slane %v1067_v4, 2  ;;  %v1192_v17 = vrot.slane %v1191_v59, 4  ;;  %v1060_v18 = vmax.f32 %v1058_v60, %v1059_v5  ;;  %v2516_v12 = vpop.f32.mrf.mxu1 }
 0x169   : > { %v1185_v21 = vrot.slane %v1184_v7, 4  ;;  %v980_v22 = vmax.f32 %v916_v1, 0.0  ;;  %v981_v23 = vmax.f32 %v917_v11, 0.0  ;;  %v915_v25 = vadd.f32 %v2453_v55, %v696_v27 }
 0x16a   : > { %v2499_v57 = vpop.f32.mrf.mxu0  ;;  %v1017_v24 = vmax.f32 %v953_v14, 0.0  ;;  %v1069_v13 = vmax.f32 %v1067_v4, %v1068_v6  ;;  %v1061_v19 = vrot.slane %v1060_v18, 2  ;;  %v978_v29 = vmax.f32 %v914_v8, 0.0  ;;  %v1858_v50 = vpop.f32.mrf.mxu1 }
 0x16b   : > { %v1014_v26 = vmax.f32 %v950_v10, 0.0  ;;  %v1079_v30 = vmax.f32 %v980_v22, %v981_v23  ;;  %v979_v33 = vmax.f32 %v915_v25, 0.0  ;;  %v951_v35 = vadd.f32 %v2453_v55, %v840_v45 }
 0x16c   : > { %v2507_v3 = vpop.f32.mrf.mxu0  ;;  %v1205_v31 = vmax.f32 %v1016_v9, %v1017_v24  ;;  %v1341_v38 = vunpack.c.l.b16 %v1254_v52  ;;  %v1181_v39 = vmax.f32 %v2483_v34, %v1180_v54  ;;  %v1174_v27 = vmax.f32 %v1172_v43, %v1173_v0 }
 0x16d   : > { %v1186_v40 = vmax.f32 %v1184_v7, %v1185_v21  ;;  %v1080_v42 = vrot.slane %v1079_v30, 4  ;;  %v1072_v47 = vmax.f32 %v978_v29, %v979_v33  ;;  %v1015_v49 = vmax.f32 %v951_v35, 0.0 }
 0x16e   : > { %v2513_v16 = vpop.f32.mrf.mxu0  ;;  %v1206_v44 = vrot.slane %v1205_v31, 4  ;;  %v1057_v51 = vmax.f32 %v2488_v41, %v1056_v62  ;;  %v1256_v56 = vpack.c.bf16 %v2502_v63, %v2502_v63  ;;  %v1070_v58 = vrot.slane %v1069_v13, 1  ;;  %v856_v63 = vpop.f32.mrf.mxu1 }
 0x16f   : > { %v1193_v60 = vmax.f32 %v1191_v59, %v1192_v17  ;;  %v1062_v61 = vmax.f32 %v1060_v18, %v1061_v19  ;;  %v1073_v1 = vrot.slane %v1072_v47, 4  ;;  %v1198_v34 = vmax.f32 %v1014_v26, %v1015_v49 }
 0x170   : > { %v2518_v28 = vpop.f32.mrf.mxu0  ;;  %v1207_v52 = vmax.f32 %v1205_v31, %v1206_v44  ;;  %v1342_v43 = vunpack.c.l.b16 %v1255_v32  ;;  %v1182_v54 = vrot.slane %v1181_v39, 1  ;;  %v1175_v0 = vrot.slane %v1174_v27, 1  ;;  %v1861_v29 = vpop.f32.mrf.mxu1 }
 0x171   : > { %v1187_v4 = vrot.slane %v1186_v40, 2  ;;  %v1081_v5 = vmax.f32 %v1079_v30, %v1080_v42  ;;  %v1074_v62 = vmax.f32 %v1072_v47, %v1073_v1  ;;  %v1199_v7 = vrot.slane %v1198_v34, 4 }
 0x172   : > { %v2521_v37 = vpop.f32.mrf.mxu0  ;;  %v1208_v41 = vrot.slane %v1207_v52, 2  ;;  %v1272_v59 = vpack.c.bf16 %v2495_v53, %v2495_v53  ;;  %v1257_v8 = vpack.c.bf16 %v1057_v51, %v1057_v51  ;;  %v1343_v9 = vunpack.c.l.b16 %v1256_v56  ;;  %v869_v56 = vpop.f32.mrf.mxu1 }
 0x173   : > { %v1194_v10 = vrot.slane %v1193_v60, 2  ;;  %v1374_v14 = vsel %vm1373_vm0, %v1342_v43, %v1341_v38  ;;  %v2537_v15 = vmax.f32 %v1069_v13, %v1070_v58  ;;  %v1063_v32 = vrot.slane %v1062_v61, 1 }
 0x174   : > { %v2527_v45 = vpop.f32.mrf.mxu0  ;;  %v1200_v6 = vmax.f32 %v1198_v34, %v1199_v7  ;;  %v2539_v17 = vmax.f32 %v1181_v39, %v1182_v54  ;;  %v2541_v18 = vmax.f32 %v1174_v27, %v1175_v0  ;;  %v2543_v21 = vmax.f32 %v1186_v40, %v1187_v4 }
 0x175   : > { %v956_v22 = vadd.f32 %v2505_v2, %v2449_v48  ;;  %v1082_v23 = vrot.slane %v1081_v5, 2  ;;  %v1209_v24 = vmax.f32 %v1207_v52, %v1208_v41  ;;  %v1075_v25 = vrot.slane %v1074_v62, 2 }
 0x176   : > { %v2534_v11 = vpop.f32.mrf.mxu0  ;;  %v1201_v19 = vrot.slane %v1200_v6, 2  ;;  %v2547_v26 = vunpack.c.l.b16 %v1257_v8  ;;  %v2550_v13 = vsel %vm1375_vm1, %v1343_v9, %v1374_v14  ;;  %v2552_v30 = vmax.f32 %v1193_v60, %v1194_v10 }
 0x177   : > { %v920_v31 = vadd.f32 %v2485_v36, %v2449_v48  ;;  %v1259_v2 = vpack.c.bf16 %v2537_v15, %v2537_v15  ;;  %v2560_v35 = vmax.f32 %v1062_v61, %v1063_v32  ;;  %v918_v39 = vadd.f32 %v2449_v48, %v2490_v46 }
 0x178   : > { %v2556_v33 = vpop.f32.mrf.mxu0  ;;  %v1202_v38 = vmax.f32 %v1200_v6, %v1201_v19  ;;  %v1020_v27 = vmax.f32 %v956_v22, 0.0  ;;  %v954_v40 = vadd.f32 %v2449_v48, %v2516_v12  ;;  %v921_v42 = vadd.f32 %v2499_v57, %v2453_v55 }
 0x179   : > { %v957_v36 = vadd.f32 %v1858_v50, %v2453_v55  ;;  %v1189_v44 = vrot.slane %v2543_v21, 1  ;;  %v2570_v47 = vmax.f32 %v1081_v5, %v1082_v23  ;;  %v1210_v49 = vrot.slane %v1209_v24, 1 }
 0x17a   : > { %v2572_v51 = vmax.f32 %v1074_v62, %v1075_v25  ;;  %v984_v58 = vmax.f32 %v920_v31, 0.0  ;;  %v985_v60 = vmax.f32 %v921_v42, 0.0  ;;  %v919_v61 = vadd.f32 %v2453_v55, %v2507_v3  ;;  %v2576_v12 = vpop.f32.mrf.mxu0  ;;  %v1862_v62 = vpop.f32.mrf.mxu1 }
 0x17b   : > { %v1021_v46 = vmax.f32 %v957_v36, 0.0  ;;  %v1203_v52 = vrot.slane %v1202_v38, 1  ;;  %v982_v57 = vmax.f32 %v918_v39, 0.0  ;;  %v1018_v1 = vmax.f32 %v954_v40, 0.0 }
 0x17c   : > { %v955_v50 = vadd.f32 %v2453_v55, %v856_v63  ;;  %v1093_v34 = vmax.f32 %v984_v58, %v985_v60  ;;  %v983_v54 = vmax.f32 %v919_v61, 0.0  ;;  %v924_v0 = vadd.f32 %v2513_v16, %v2449_v48  ;;  %v2586_v63 = vpop.f32.mrf.mxu0 }
 0x17d   : > { %v1219_v43 = vmax.f32 %v1020_v27, %v1021_v46  ;;  %v1084_v4 = vrot.slane %v2570_v47, 1  ;;  %v2582_v5 = vmax.f32 %v1209_v24, %v1210_v49  ;;  %v960_v3 = vadd.f32 %v1861_v29, %v2449_v48  ;;  %v872_v27 = vpop.f32.mrf.mxu1 }
 0x17e   : > { %v1019_v41 = vmax.f32 %v955_v50, 0.0  ;;  %v1077_v7 = vrot.slane %v2572_v51, 1  ;;  %v1094_v8 = vrot.slane %v1093_v34, 4  ;;  %v1086_v10 = vmax.f32 %v982_v57, %v983_v54  ;;  %v2595_v49 = vpop.f32.mrf.mxu0 }
 0x17f   : > { %v1220_v9 = vrot.slane %v1219_v43, 4  ;;  %v2588_v14 = vmax.f32 %v1202_v38, %v1203_v52  ;;  %v988_v6 = vmax.f32 %v924_v0, 0.0  ;;  %v922_v16 = vadd.f32 %v2449_v48, %v2518_v28 }
 0x180   : > { %v1212_v32 = vmax.f32 %v1018_v1, %v1019_v41  ;;  %v1095_v22 = vmax.f32 %v1093_v34, %v1094_v8  ;;  %v1087_v24 = vrot.slane %v1086_v10, 4  ;;  %v958_v25 = vadd.f32 %v2449_v48, %v869_v56 }
 0x181   : > { %v1221_v23 = vmax.f32 %v1219_v43, %v1220_v9  ;;  %v1024_v29 = vmax.f32 %v960_v3, 0.0  ;;  %v986_v31 = vmax.f32 %v922_v16, 0.0  ;;  %v925_v39 = vadd.f32 %v2521_v37, %v2453_v55  ;;  %v2601_v3 = vpop.f32.mrf.mxu0 }
 0x182   : > { %v1213_v19 = vrot.slane %v1212_v32, 4  ;;  %v1096_v40 = vrot.slane %v1095_v22, 2  ;;  %v1088_v42 = vmax.f32 %v1086_v10, %v1087_v24  ;;  %v1022_v36 = vmax.f32 %v958_v25, 0.0 }
 0x183   : > { %v1222_v38 = vrot.slane %v1221_v23, 2  ;;  %v989_v28 = vmax.f32 %v925_v39, 0.0  ;;  %v961_v60 = vadd.f32 %v1862_v62, %v2453_v55  ;;  %v923_v56 = vadd.f32 %v2453_v55, %v2527_v45  ;;  %v1865_v45 = vpop.f32.mrf.mxu1 }
 0x184   : > { %v1214_v58 = vmax.f32 %v1212_v32, %v1213_v19  ;;  %v1097_v46 = vmax.f32 %v1095_v22, %v1096_v40  ;;  %v1089_v52 = vrot.slane %v1088_v42, 2  ;;  %v959_v57 = vadd.f32 %v2453_v55, %v872_v27 }
 0x185   : > { %v1223_v61 = vmax.f32 %v1221_v23, %v1222_v38  ;;  %v1107_v1 = vmax.f32 %v988_v6, %v989_v28  ;;  %v1025_v50 = vmax.f32 %v961_v60, 0.0  ;;  %v987_v34 = vmax.f32 %v923_v56, 0.0 }
 0x186   : > { %v1215_v37 = vrot.slane %v1214_v58, 2  ;;  %v1098_v43 = vrot.slane %v1097_v46, 1  ;;  %v1090_v0 = vmax.f32 %v1088_v42, %v1089_v52  ;;  %v1023_v41 = vmax.f32 %v959_v57, 0.0 }
 0x187   : > { %v1224_v54 = vrot.slane %v1223_v61, 1  ;;  %v1108_v62 = vrot.slane %v1107_v1, 4  ;;  %v1233_v9 = vmax.f32 %v1024_v29, %v1025_v50  ;;  %v1100_v10 = vmax.f32 %v986_v31, %v987_v34  ;;  %v2608_v29 = vpop.f32.mrf.mxu0 }
 0x188   : > { %v1216_v8 = vmax.f32 %v1214_v58, %v1215_v37  ;;  %v1279_v32 = vpack.c.bf16 %v2582_v5, %v2582_v5  ;;  %v1078_v16 = vmax.f32 %v2572_v51, %v1077_v7  ;;  %v1091_v22 = vrot.slane %v1090_v0, 1  ;;  %v885_v7 = vpop.f32.mrf.mxu1 }
 0x189   : > { %v1226_v6 = vmax.f32 %v1022_v36, %v1023_v41  ;;  %v1109_v24 = vmax.f32 %v1107_v1, %v1108_v62  ;;  %v1234_v25 = vrot.slane %v1233_v9, 4  ;;  %v1101_v19 = vrot.slane %v1100_v10, 4  ;;  %v760_v1 = vpop.f32.mrf.mxu0 }
 0x18a   : > { %v1217_v23 = vrot.slane %v1216_v8, 1  ;;  %v1278_v39 = vpack.c.bf16 %v2588_v14, %v2588_v14  ;;  %v1099_v27 = vmax.f32 %v1097_v46, %v1098_v43  ;;  %v1225_v40 = vmax.f32 %v1223_v61, %v1224_v54  ;;  %v1866_v15 = vpop.f32.mrf.mxu1 }
 0x18b   : > { %v1227_v38 = vrot.slane %v1226_v6, 4  ;;  %v1258_v31 = vpack.c.bf16 %v2560_v35, %v2560_v35  ;;  %v1092_v5 = vmax.f32 %v1090_v0, %v1091_v22  ;;  %v1110_v42 = vrot.slane %v1109_v24, 2 }
 0x18c   : > { %v1102_v51 = vmax.f32 %v1100_v10, %v1101_v19  ;;  %v1196_v36 = vrot.slane %v2552_v30, 1  ;;  %v2616_v58 = vmax.f32 %v2570_v47, %v1084_v4  ;;  %v1218_v14 = vmax.f32 %v1216_v8, %v1217_v23 }
 0x18d   : > { %v1235_v28 = vmax.f32 %v1233_v9, %v1234_v25  ;;  %v2621_v60 = vunpack.c.l.b16 %v1259_v2  ;;  %v1260_v56 = vpack.c.bf16 %v1078_v16, %v1078_v16  ;;  %v1111_v35 = vmax.f32 %v1109_v24, %v1110_v42  ;;  %v1837_v16 = vpop.f32.mrf.mxu0  ;;  %v888_v24 = vpop.f32.mrf.mxu1 }
 0x18e   : > { %v1228_v46 = vmax.f32 %v1226_v6, %v1227_v38  ;;  %v1366_v61 = vunpack.c.l.b16 %v1279_v32  ;;  %v1365_v52 = vunpack.c.l.b16 %v1278_v39  ;;  %v1263_v57 = vpack.c.bf16 %v1099_v27, %v1099_v27 }
 0x18f   : > { %v1281_v37 = vpack.c.bf16 %v1225_v40, %v1225_v40  ;;  %v2623_v50 = vunpack.c.l.b16 %v1258_v31  ;;  %v2628_v47 = vmax.f32 %v2543_v21, %v1189_v44  ;;  %v1262_v4 = vpack.c.bf16 %v1092_v5, %v1092_v5 }
 0x190   : > { %v1103_v34 = vrot.slane %v1102_v51, 2  ;;  %v1261_v2 = vpack.c.bf16 %v2616_v58, %v2616_v58  ;;  %v1280_v43 = vpack.c.bf16 %v1218_v14, %v1218_v14  ;;  %v1236_v54 = vrot.slane %v1235_v28, 2 }
 0x191   : > { %v964_v0 = vadd.f32 %v1865_v45, %v2449_v48  ;;  %v2633_v41 = vunpack.c.l.b16 %v1260_v56  ;;  %v1112_v8 = vrot.slane %v1111_v35, 1  ;;  %v1229_v62 = vrot.slane %v1228_v46, 2 }
 0x192   : > { %v928_v9 = vadd.f32 %v2534_v11, %v2449_v48  ;;  %v1401_v21 = vsel %vm1373_vm0, %v1366_v61, %v1365_v52  ;;  %v1350_v44 = vunpack.c.l.b16 %v1263_v57  ;;  %v2638_v10 = vunpack.c.l.b16 %v1281_v37 }
 0x193   : > { %v962_v32 = vadd.f32 %v2449_v48, %v885_v7  ;;  %v1349_v22 = vunpack.c.l.b16 %v1262_v4  ;;  %v1104_v6 = vmax.f32 %v1102_v51, %v1103_v34  ;;  %v926_v45 = vadd.f32 %v2449_v48, %v2556_v33 }
 0x194   : > { %v929_v23 = vadd.f32 %v2576_v12, %v2453_v55  ;;  %v1367_v25 = vunpack.c.l.b16 %v1280_v43  ;;  %v1237_v19 = vmax.f32 %v1235_v28, %v1236_v54  ;;  %v1028_v11 = vmax.f32 %v964_v0, 0.0  ;;  %v773_v12 = vpop.f32.mrf.mxu0 }
 0x195   : > { %v965_v39 = vadd.f32 %v1866_v15, %v2453_v55  ;;  %v2646_v27 = vmax.f32 %v1111_v35, %v1112_v8  ;;  %v2648_v40 = vmax.f32 %v1228_v46, %v1229_v62  ;;  %v992_v38 = vmax.f32 %v928_v9, 0.0 }
 0x196   : > { %v993_v31 = vmax.f32 %v929_v23, 0.0  ;;  %v1026_v5 = vmax.f32 %v962_v32, 0.0  ;;  %v927_v33 = vadd.f32 %v2453_v55, %v2586_v63  ;;  %v963_v51 = vadd.f32 %v2453_v55, %v888_v24  ;;  %v1838_v0 = vpop.f32.mrf.mxu0 }
 0x197   : > { %v1029_v42 = vmax.f32 %v965_v39, 0.0  ;;  %v2654_v7 = vsel %vm1373_vm0, %v1350_v44, %v1349_v22  ;;  %v1105_v14 = vrot.slane %v1104_v6, 1  ;;  %v990_v28 = vmax.f32 %v926_v45, 0.0 }
 0x198   : > { %v1121_v56 = vmax.f32 %v992_v38, %v993_v31  ;;  %v991_v61 = vmax.f32 %v927_v33, 0.0  ;;  %v1027_v46 = vmax.f32 %v963_v51, 0.0  ;;  %v932_v52 = vadd.f32 %v2595_v49, %v2449_v48 }
 0x199   : > { %v1247_v35 = vmax.f32 %v1028_v11, %v1029_v42  ;;  %v2659_v57 = vsel %vm1375_vm1, %v1367_v25, %v1401_v21  ;;  %v1238_v37 = vrot.slane %v1237_v19, 1  ;;  %v930_v4 = vadd.f32 %v2449_v48, %v2601_v3 }
 0x19a   : > { %v1122_v63 = vrot.slane %v1121_v56, 4  ;;  %v1265_v34 = vpack.c.bf16 %v2646_v27, %v2646_v27  ;;  %v1231_v15 = vrot.slane %v2648_v40, 1  ;;  %v1114_v43 = vmax.f32 %v990_v28, %v991_v61  ;;  %v776_v27 = vpop.f32.mrf.mxu0 }
 0x19b   : > { %v1240_v54 = vmax.f32 %v1026_v5, %v1027_v46  ;;  %v1106_v8 = vmax.f32 %v1104_v6, %v1105_v14  ;;  %v933_v49 = vadd.f32 %v2608_v29, %v2453_v55  ;;  %v931_v9 = vadd.f32 %v2453_v55, %v760_v1 }
 0x19c   : > { %v1123_v62 = vmax.f32 %v1121_v56, %v1122_v63  ;;  %v1248_v21 = vrot.slane %v1247_v35, 4  ;;  %v1115_v44 = vrot.slane %v1114_v43, 4  ;;  %v996_v22 = vmax.f32 %v932_v52, 0.0 }
 0x19d   : > { %v1241_v32 = vrot.slane %v1240_v54, 4  ;;  %v994_v45 = vmax.f32 %v930_v4, 0.0  ;;  %v997_v23 = vmax.f32 %v933_v49, 0.0  ;;  %v995_v24 = vmax.f32 %v931_v9, 0.0 }
 0x19e   : > { %v1124_v3 = vrot.slane %v1123_v62, 2  ;;  %v2669_v25 = vmax.f32 %v1237_v19, %v1238_v37  ;;  %v1116_v11 = vmax.f32 %v1114_v43, %v1115_v44  ;;  %v936_v6 = vadd.f32 %v1837_v16, %v2449_v48 }
 0x19f   : > { %v1242_v39 = vmax.f32 %v1240_v54, %v1241_v32  ;;  %v1135_v29 = vmax.f32 %v996_v22, %v997_v23  ;;  %v1128_v31 = vmax.f32 %v994_v45, %v995_v24  ;;  %v934_v1 = vadd.f32 %v2449_v48, %v773_v12 }
 0x1a0   : > { %v1125_v38 = vmax.f32 %v1123_v62, %v1124_v3  ;;  %v1249_v5 = vmax.f32 %v1247_v35, %v1248_v21  ;;  %v1117_v42 = vrot.slane %v1116_v11, 2  ;;  %v937_v51 = vadd.f32 %v1838_v0, %v2453_v55 }
 0x1a1   : > { %v1243_v33 = vrot.slane %v1242_v39, 2  ;;  %v1264_v14 = vpack.c.bf16 %v1106_v8, %v1106_v8  ;;  %v1136_v19 = vrot.slane %v1135_v29, 4  ;;  %v1129_v28 = vrot.slane %v1128_v31, 4 }
 0x1a2   : > { %v935_v56 = vadd.f32 %v2453_v55, %v776_v27  ;;  %v1126_v61 = vrot.slane %v1125_v38, 1  ;;  %v1118_v16 = vmax.f32 %v1116_v11, %v1117_v42  ;;  %v1000_v46 = vmax.f32 %v936_v6, 0.0 }
 0x1a3   : > { %v1001_v52 = vmax.f32 %v937_v51, 0.0  ;;  %v1137_v37 = vmax.f32 %v1135_v29, %v1136_v19  ;;  %v1130_v63 = vmax.f32 %v1128_v31, %v1129_v28  ;;  %v998_v4 = vmax.f32 %v934_v1, 0.0 }
 0x1a4   : > { %v999_v43 = vmax.f32 %v935_v56, 0.0  ;;  %v1250_v48 = vrot.slane %v1249_v5, 2  ;;  %v1119_v12 = vrot.slane %v1118_v16, 1  ;;  %v1244_v35 = vmax.f32 %v1242_v39, %v1243_v33 }
 0x1a5   : > { %v1149_v54 = vmax.f32 %v1000_v46, %v1001_v52  ;;  %v1351_v0 = vunpack.c.l.b16 %v1264_v14  ;;  %v1138_v8 = vrot.slane %v1137_v37, 2  ;;  %v1131_v62 = vrot.slane %v1130_v63, 2 }
 0x1a6   : > { %v1142_v49 = vmax.f32 %v998_v4, %v999_v43  ;;  %v1232_v55 = vmax.f32 %v2648_v40, %v1231_v15  ;;  %v1127_v9 = vmax.f32 %v1125_v38, %v1126_v61  ;;  %v1120_v21 = vmax.f32 %v1118_v16, %v1119_v12 }
 0x1a7   : > { %v1150_v44 = vrot.slane %v1149_v54, 4  ;;  %v1352_v32 = vunpack.c.l.b16 %v1265_v34  ;;  %v1139_v22 = vmax.f32 %v1137_v37, %v1138_v8  ;;  %v1132_v3 = vmax.f32 %v1130_v63, %v1131_v62 }
 0x1a8   : > { %v1143_v45 = vrot.slane %v1142_v49, 4  ;;  %v1251_v23 = vmax.f32 %v1249_v5, %v1250_v48  ;;  %v1266_v24 = vpack.c.bf16 %v1120_v21, %v1120_v21  ;;  %v1245_v11 = vrot.slane %v1244_v35, 1 }
 0x1a9   : > { %v1151_v39 = vmax.f32 %v1149_v54, %v1150_v44  ;;  %v1388_v6 = vsel %vm1375_vm1, %v1351_v0, %v2654_v7  ;;  %v1140_v27 = vrot.slane %v1139_v22, 1  ;;  %v1133_v29 = vrot.slane %v1132_v3, 1 }
 0x1aa   : > { %v1144_v31 = vmax.f32 %v1142_v49, %v1143_v45  ;;  %v1267_v1 = vpack.c.bf16 %v1127_v9, %v1127_v9  ;;  %v1353_v40 = vunpack.c.l.b16 %v1266_v24  ;;  %v1378_v34 = vsel %vm1377_vm2, %v2547_v26, %v2550_v13 }
 0x1ab   : > { %v1152_v15 = vrot.slane %v1151_v39, 2  ;;  %v1141_v38 = vmax.f32 %v1139_v22, %v1140_v27  ;;  %v1134_v42 = vmax.f32 %v1132_v3, %v1133_v29  ;;  %v1380_v5 = vsel %vm1379_vm3, %v2623_v50, %v1378_v34 }
 0x1ac   : > { %v1145_v33 = vrot.slane %v1144_v31, 2  ;;  %v1282_v51 = vpack.c.bf16 %v1232_v55, %v1232_v55  ;;  %v1252_v14 = vrot.slane %v1251_v23, 1  ;;  %v1246_v19 = vmax.f32 %v1244_v35, %v1245_v11 }
 0x1ad   : > { %v1153_v7 = vmax.f32 %v1151_v39, %v1152_v15  ;;  %v1269_v28 = vpack.c.bf16 %v1141_v38, %v1141_v38  ;;  %v1268_v56 = vpack.c.bf16 %v1134_v42, %v1134_v42  ;;  %v1389_v16 = vsel %vm1377_vm2, %v1352_v32, %v1388_v6 }
 0x1ae   : > { %v1146_v61 = vmax.f32 %v1144_v31, %v1145_v33  ;;  %v1354_v46 = vunpack.c.l.b16 %v1267_v1  ;;  %v1382_v26 = vsel %vm1381_vm4, %v2621_v60, %v1380_v5  ;;  %v1390_v13 = vsel %vm1379_vm3, %v1353_v40, %v1389_v16  ;;  %v1701_v33 = vld [vmem:[%s2783_s4] ss:$0 sm:$0xff] }
 0x1af   : > { %v1154_v52 = vrot.slane %v1153_v7, 1  ;;  %v1283_v37 = vpack.c.bf16 %v2669_v25, %v2669_v25  ;;  %v1355_v50 = vunpack.c.l.b16 %v1268_v56  ;;  %v1384_v4 = vsel %vm1383_vm5, %v2633_v41, %v1382_v26 }
 0x1b0   : > { %v1147_v63 = vrot.slane %v1146_v61, 1  ;;  %v1348_v48 = vunpack.c.l.b16 %v1261_v2  ;;  %v1356_v12 = vunpack.c.l.b16 %v1269_v28  ;;  %v1391_v35 = vsel %vm1381_vm4, %v1354_v46, %v1390_v13 }
 0x1b1   : > { %v1155_v43 = vmax.f32 %v1153_v7, %v1154_v52  ;;  %v1369_v54 = vunpack.c.l.b16 %v1282_v51  ;;  %v1253_v60 = vmax.f32 %v1251_v23, %v1252_v14  ;;  %v1392_v8 = vsel %vm1383_vm5, %v1355_v50, %v1391_v35 }
 0x1b2   : > { %v1148_v0 = vmax.f32 %v1146_v61, %v1147_v63  ;;  %v1284_v62 = vpack.c.bf16 %v1246_v19, %v1246_v19  ;;  %v1386_v49 = vsel %vm1385_vm6, %v1348_v48, %v1384_v4  ;;  %v1393_v55 = vsel %vm1385_vm6, %v1356_v12, %v1392_v8 }
 0x1b3   : > { %v1271_v25 = vpack.c.bf16 %v1155_v43, %v1155_v43  ;;  %v1273_v41 = vpack.c.bf16 %v2472_v20, %v2472_v20  ;;  %v1197_v58 = vmax.f32 %v2552_v30, %v1196_v36  ;;  %v1408_v9 = vpack.c.b16 %v1393_v55, %v1386_v49 }
 0x1b4   : > { %v1270_v2 = vpack.c.bf16 %v1148_v0, %v1148_v0  ;;  %v1275_v21 = vpack.c.bf16 %v2539_v17, %v2539_v17  ;;  %v1274_v44 = vpack.c.bf16 %v2541_v18, %v2541_v18  ;;  %v1403_v32 = vsel %vm1377_vm2, %v2638_v10, %v2659_v57 }
 0x1b5   : > { %v1370_v22 = vunpack.c.l.b16 %v1283_v37  ;;  %v1285_v3 = vpack.c.bf16 %v1253_v60, %v1253_v60  ;;  %v1358_v45 = vunpack.c.l.b16 %v1271_v25  ;;  %1883 = vmatprep.mubr.bf16.mxu1 %v1408_v9  ;;  %v1359_v30 = vunpack.c.l.b16 %v1272_v59 }
 0x1b6   : > { %v1357_v20 = vunpack.c.l.b16 %v1270_v2  ;;  %v1276_v36 = vpack.c.bf16 %v2628_v47, %v2628_v47  ;;  %v1404_v17 = vsel %vm1379_vm3, %v1369_v54, %v1403_v32  ;;  %v1371_v23 = vunpack.c.l.b16 %v1284_v62 }
 0x1b7   : > { %v1360_v18 = vunpack.c.l.b16 %v1273_v41  ;;  %v1277_v24 = vpack.c.bf16 %v1197_v58, %v1197_v58  ;;  %v1361_v10 = vunpack.c.l.b16 %v1274_v44  ;;  %v1362_v39 = vunpack.c.l.b16 %v1275_v21 }
 0x1b8   : > { %v1394_v11 = vsel %vm1373_vm0, %v1358_v45, %v1357_v20  ;;  %v1372_v6 = vunpack.c.l.b16 %v1285_v3  ;;  %v1405_v53 = vsel %vm1381_vm4, %v1370_v22, %v1404_v17  ;;  %v1363_v59 = vunpack.c.l.b16 %v1276_v36 }
 0x1b9   : > { %v1395_v57 = vsel %vm1375_vm1, %v1359_v30, %v1394_v11  ;;  %v1406_v29 = vsel %vm1383_vm5, %v1371_v23, %v1405_v53  ;;  %v1364_v31 = vunpack.c.l.b16 %v1277_v24 }
 0x1ba   : > { %v1396_v27 = vsel %vm1377_vm2, %v1360_v18, %v1395_v57  ;;  %v1407_v34 = vsel %vm1385_vm6, %v1372_v6, %v1406_v29 }
 0x1bb   : > { %v1397_v47 = vsel %vm1379_vm3, %v1361_v10, %v1396_v27 }
 0x1bc   : > { %v1398_v1 = vsel %vm1381_vm4, %v1362_v39, %v1397_v47 }
 0x1bd   : > { %v1399_v40 = vsel %vm1383_vm5, %v1363_v59, %v1398_v1 }
 0x1be   : > { %v1400_v15 = vsel %vm1385_vm6, %v1364_v31, %v1399_v40 }
 0x1bf   : > { %v1409_v38 = vpack.c.b16 %v1407_v34, %v1400_v15 }
 0x1c1   : > { %1884 = vmatmul.mubr.bf16.vlgmr.msra.gmra.mxu1 %v1409_v38 }
 0x281   : > { %v1885_v42 = vpop.f32.mrf.mxu1 }
 0x282   : > { %v1503_v14 = vadd.f32 %v1885_v42, %v1701_v33 }
 0x283   : > { %v1494_v5 = vpop.f32.mrf.mxu1 }
 0x284   : > { %v1495_v28 = vadd.f32 %v1701_v33, %v1494_v5 }
 0x285   : > { %v1886_v51 = vpop.f32.mrf.mxu1 }
 0x286   : > { %v1506_v19 = vadd.f32 %v1886_v51, %v1701_v33 }
 0x287   : > { %v1497_v7 = vpop.f32.mrf.mxu1 }
 0x288   : > { %v1734_v56 = vpack.c.bf16 %v1506_v19, %v1503_v14  ;;  %v1498_v61 = vadd.f32 %v1701_v33, %v1497_v7 }
 0x28a   : > { %1736 = vst [vmem:[%s287_s17 + $0x8] sm:$0xff] %v1734_v56   ;;  %v1729_v16 = vpack.c.bf16 %v1498_v61, %v1495_v28 }
 0x28c   : > { %1730 = vst [vmem:[%s287_s17] sm:$0xff] %v1729_v16  }
 0x28d   : > { %2153 = shalt.err (!%p2150_p9)
}
 0x28e   : > { %s2154_s14 = scalar_lea.hbm %s2736_s12, 256  ;;  %s2158_s26 = scalar_lea.hbm %s2784_s5, 512 }
 0x28f   : > { %p2155_p1 = scmp.ne.s32.totalorder %s2736_s12, %s2154_s14  ;;  %p2159_p8 = scmp.lt.s32.totalorder %s2736_s12, %s2784_s5 }
 0x290   : > { %p2160_p3 = scmp.lt.s32.totalorder %s2158_s26, %s2154_s14 }
 0x291   : > { %p2156_p4 = pnand %p2155_p1, %p2803_p12 }
 0x292   : > { %p2161_p11 = por %p2160_p3, %p2159_p8 }
 0x293   : > { %p2157_p6 = pneg %p2156_p4 }
 0x295   : > { %p2162_p7 = pnand %p2161_p11, %p2157_p6 }
 0x297   : > { %2165 = shalt.err (!%p2162_p7)
}
 0x298   : > { %s2223_s30 = smov 64   ;;  %s2224_s6 = smov 4  }
 0x299   : > { %1917 = dma.vmem_to_hbm [thread:$0]  (%p2803_p12), %s2731_s28, 256, %s2736_s12, %s1530_s23, %s2223_s30, %s2223_s30, %s2224_s6  }
 0x29a PF: > { %s1558_s16 = sand.u32 1, %s2200_s18   ;;  %p2804_p13 = scmp.ne.s32.totalorder %s2791_s25, 0 }
 0x29b   : > { %p2805_p0 = scmp.ge.s32.totalorder %s2212_s21, 2  ;;  %s1559_s29 = scalar_lea.sflag [#allocation4], %s1558_s16 }
 0x29d   : > { %p1934_p5 = pnand %p2805_p0, %p2804_p13 }
 0x29f   : > { %p1935_p10 = pneg %p1934_p5 }
 0x2a1   : > { %2195 = dma.done.wait (%p1935_p10), %s1559_s29, 256  }
 0x2a2   : > { %2197 = vsyncadd (%p1935_p10), %s1559_s29, 4294967040  ;;  %p20_p2 = scmp.ge.s32.totalorder %s2330_s27, 4   ;;  %s2806_s18 = smov %s2204_s19 }
 0x2a3   : > { %s2807_s19 = smov %s2208_s20  ;;  %s2808_s20 = smov %s2351_s10 }
 0x2a4   : > { %s2809_s21 = smov %s2330_s27  ;;  %22 = sbr.rel (!%p20_p2) target bundleno = 7 (0x7), region = 97 }
 0x2a9   :  { %1564 = vsyncpa [#allocation3], 1 }
 0x2aa   :  { %1566 = vsyncpa [#allocation3 + $0x1], 1 }
 0x2ab   :  { %1567 = vsyncpa [#allocation6], 1 }
 0x2ac   :  { %1568 = vsyncpa [#allocation9], 1 }
 0x2ad   :  { %1569 = vsyncpa [#allocation4], 1 }
 0x2ae   :  { %1571 = vsyncpa [#allocation4 + $0x1], 1 }

</bundles_post_ra>
